<compile_context>
chip_gen: v7x
topology: tpu7x:2x2x1
jax: 0.10.0
libtpu: 0.0.40
codegen_flags: <defaults>
</compile_context>

<pallas_src>
import math

import jax
import jax.numpy as jnp
from jax.experimental import pallas as pl
from jax.experimental.pallas import tpu as pltpu

NEG_SLOPE = 0.01   # torch.nn.LeakyReLU default
HIDDEN = 32


def _round_up(x, m):
    return ((x + m - 1) // m) * m


def _leaky_relu(x):
    # max(x, a*x) == LeakyReLU for 0 < a < 1; 2 VPU ops (vmul+vmax) instead of
    # 3 (vcmp+vmul+vsel) for where(x > 0, x, a*x).
    return jnp.maximum(x, NEG_SLOPE * x)


def _mlp2_kernel(x_ref, w1_ref, b1_ref, w2_ref, b2_ref, o_ref):
    """One row tile: LeakyReLU(LeakyReLU(x @ W1 + b1) @ W2 + b2).

    Shapes are the lane-packed ones: x (bm, pack*D), W1 (pack*D, pack*H),
    W2 (pack*H, pack*H), biases (1, pack*H), out (bm, pack*H) with
    pack*H == 128 for H == 32.  Activations feed the MXU in their native dtype
    (no f32 upcast of the tile); accumulation is f32 via
    preferred_element_type, and bias + LeakyReLU run in f32.
    """
    h = jnp.dot(x_ref[...], w1_ref[...], preferred_element_type=jnp.float32)
    h = _leaky_relu(h + b1_ref[...])
    h = h.astype(w2_ref.dtype)             # native-dtype MXU path for layer 2
    y = jnp.dot(h, w2_ref[...], preferred_element_type=jnp.float32)
    y = _leaky_relu(y + b2_ref[...])
    o_ref[...] = y.astype(o_ref.dtype)


def _mlp2_one_type(x, w1, b1, w2, b2, *, tile_rows, out_dtype, x_buffers,
                   vmem_limit_bytes):
    """2-layer MLP for one node type; x streams straight HBM -> pipeline."""
    n, d = x.shape
    hdim = w1.shape[1]
    assert w1.shape[0] == d and b1.shape == (hdim,)
    assert w2.shape == (hdim, hdim) and b2.shape == (hdim,)
    out_dtype = jnp.dtype(x.dtype if out_dtype is None else out_dtype)
    if n == 0:
        return jnp.zeros((0, hdim), out_dtype)

    compute_dtype = jnp.dtype(x.dtype)
    itemsize = compute_dtype.itemsize
    sublane_min = 16 if itemsize == 2 else 8   # (16,128) tiling for 2-byte dtypes

    # Lane packing: `pack` logical rows per slab row -> 128-wide output lanes.
    pack = 128 // hdim if (hdim <= 128 and 128 % hdim == 0) else 1
    n_pad = _round_up(n, pack)
    # Only pays a copy when N is not already a multiple of `pack` (<=3 rows).
    x_in = x if n_pad == n else jnp.pad(x, ((0, n_pad - n), (0, 0)))
    np_rows = n_pad // pack
    x_packed = x_in.reshape(np_rows, pack * d)       # free row-major reshape

    # Block-diagonal weight replication -> MXU sees K = pack*D, N = pack*H.
    # Weights cast to the activation dtype; biases stay f32 (added to f32 acc).
    eye = jnp.eye(pack, dtype=jnp.float32)
    w1_bd = jnp.kron(eye, w1.astype(jnp.float32)).astype(compute_dtype)
    w2_bd = jnp.kron(eye, w2.astype(jnp.float32)).astype(compute_dtype)
    b1_t = jnp.tile(b1.astype(jnp.float32), pack).reshape(1, pack * hdim)
    b2_t = jnp.tile(b2.astype(jnp.float32), pack).reshape(1, pack * hdim)

    # Row tiling with a dtype-aware sublane constraint.
    assert tile_rows % (pack * sublane_min) == 0, (
        f"tile_rows={tile_rows} must be a multiple of {pack * sublane_min} "
        f"for dtype {compute_dtype}")
    tile_pr = tile_rows // pack                      # packed rows per tile
    if np_rows <= tile_pr:
        tile_pr = np_rows                            # single full-array block is always legal
        if np_rows >= 2 * sublane_min:
            # v7x has 2 TensorCores: give the "parallel" row axis >= 2 tiles
            # when there is enough work (harmless extra grid step on v5e/v6e).
            tile_pr = _round_up(pl.cdiv(np_rows, 2), sublane_min)
    # Partial last tile (np_rows % tile_pr != 0) is handled by Pallas: padded
    # rows read garbage, out-of-bounds writes are dropped; each output row
    # depends only on its own input row so no valid row is affected.
    num_tiles = pl.cdiv(np_rows, tile_pr)

    x_spec_kwargs = {}
    if x_buffers is not None and x_buffers != 2:
        # Deepen the activation pipeline if profiling shows exposed DMA waits.
        x_spec_kwargs["pipeline_mode"] = pl.Buffered(x_buffers)
    in_specs = [
        pl.BlockSpec((tile_pr, pack * d), lambda i: (i, 0), **x_spec_kwargs),
        pl.BlockSpec((pack * d, pack * hdim), lambda i: (0, 0)),     # W1 (VMEM-resident)
        pl.BlockSpec((1, pack * hdim), lambda i: (0, 0)),            # b1
        pl.BlockSpec((pack * hdim, pack * hdim), lambda i: (0, 0)),  # W2
        pl.BlockSpec((1, pack * hdim), lambda i: (0, 0)),            # b2
    ]
    out_spec = pl.BlockSpec((tile_pr, pack * hdim), lambda i: (i, 0))

    # VMEM budget derived from the actual blocks; capped at 56 MiB (safe under
    # v7x's 64 MiB physical VMEM, plenty of headroom on v5e/v6e's 128 MiB).
    out_itemsize = out_dtype.itemsize
    if vmem_limit_bytes is None:
        n_x_buf = x_buffers if (x_buffers and x_buffers > 2) else 2
        x_blk = tile_pr * pack * d * itemsize
        o_blk = tile_pr * pack * hdim * out_itemsize
        w_bytes = ((w1_bd.size + w2_bd.size) * itemsize
                   + (b1_t.size + b2_t.size) * 4)
        needed = n_x_buf * x_blk + 2 * o_blk + 2 * w_bytes + (2 << 20)
        vmem_limit_bytes = int(min(56 << 20, max(2 * needed, 16 << 20)))

    cost = pl.CostEstimate(
        flops=2 * np_rows * ((pack * d) * (pack * hdim) + (pack * hdim) ** 2),
        transcendentals=0,
        bytes_accessed=int(x_packed.size * itemsize
                           + np_rows * pack * hdim * out_itemsize
                           + (w1_bd.size + w2_bd.size) * itemsize
                           + (b1_t.size + b2_t.size) * 4),
    )

    out_packed = pl.pallas_call(
        _mlp2_kernel,
        out_shape=jax.ShapeDtypeStruct((np_rows, pack * hdim), out_dtype),
        grid=(num_tiles,),
        in_specs=in_specs,
        out_specs=out_spec,
        compiler_params=pltpu.CompilerParams(
            dimension_semantics=("parallel",),       # megacore sharding on v7x
            vmem_limit_bytes=vmem_limit_bytes,
        ),
        cost_estimate=cost,
    )(x_packed, w1_bd, b1_t, w2_bd, b2_t)

    out = out_packed.reshape(n_pad, hdim)            # free reshape back to [N_pad, H]
    return out if n_pad == n else out[:n]            # slice only when we had to pad


def hetero_mlp_forward(params, x_dict, *, tile_rows=2048, out_dtype=None,
                       x_buffers=2, vmem_limit_bytes=None):
    """hetero_MLP.forward: dict of per-type features -> dict of per-type [N_t, H].

    params[node_type] = (w1 [D_t, H], b1 [H], w2 [H, H], b2 [H]) in f32.
    x_dict[node_type] = [N_t, D_t] features (f32 or bf16).
    out_dtype=None keeps the input dtype; pass jnp.bfloat16 to cut writeback.
    """
    out_dict = {}
    for nt, (w1, b1, w2, b2) in params.items():
        assert nt in x_dict
        out_dict[nt] = _mlp2_one_type(
            x_dict[nt], w1, b1, w2, b2, tile_rows=tile_rows,
            out_dtype=out_dtype, x_buffers=x_buffers,
            vmem_limit_bytes=vmem_limit_bytes)
    return out_dict


def _init_linear(key, fan_in, fan_out):
    """torch.nn.Linear-style init (uniform +-1/sqrt(fan_in)); W stored [in, out]."""
    kw, kb = jax.random.split(key)
    bound = 1.0 / math.sqrt(fan_in)
    w = jax.random.uniform(kw, (fan_in, fan_out), jnp.float32, -bound, bound)
    b = jax.random.uniform(kb, (fan_out,), jnp.float32, -bound, bound)
    return w, b


def init_hetero_mlp_params(key, node_feat_dims, hidden_channels):
    params = {}
    for i, (nt, d) in enumerate(sorted(node_feat_dims.items())):
        k1, k2 = jax.random.split(jax.random.fold_in(key, i))
        w1, b1 = _init_linear(k1, d, hidden_channels)
        w2, b2 = _init_linear(k2, hidden_channels, hidden_channels)
        params[nt] = (w1, b1, w2, b2)
    return params


def _reference_forward(params, x_dict):
    out = {}
    for nt, x in x_dict.items():
        w1, b1, w2, b2 = params[nt]
        h = _leaky_relu(x.astype(jnp.float32) @ w1 + b1)
        out[nt] = _leaky_relu(h @ w2 + b2)
    return out


if __name__ == "__main__":
    key = jax.random.PRNGKey(0)

    hidden_channels = HIDDEN
    # heterogeneous node types with different (Lazy-inferred) input dims;
    # paper's 26 rows exercise the (rare) pad-to-multiple-of-4 path.
    node_feat_dims = {"author": 16, "paper": 24}
    num_nodes = {"author": 48, "paper": 26}

    kx, kp = jax.random.split(key)
    x_dict = {
        nt: jax.random.normal(jax.random.fold_in(kx, i),
                              (num_nodes[nt], d), jnp.float32)
        for i, (nt, d) in enumerate(sorted(node_feat_dims.items()))
    }
    params = init_hetero_mlp_params(kp, node_feat_dims, hidden_channels)

    # Small tile so the tiny demo still exercises multiple pipelined grid tiles
    # and a partial last tile (production default: tile_rows=2048).
    out = hetero_mlp_forward(params, x_dict, tile_rows=32)
    out = jax.tree_util.tree_map(jax.block_until_ready, out)

    ref = _reference_forward(params, x_dict)
    for nt in x_dict:
        assert out[nt].shape == (num_nodes[nt], hidden_channels)
        assert out[nt].dtype == x_dict[nt].dtype
        assert jnp.allclose(out[nt], ref[nt], atol=1e-5, rtol=1e-5), nt

    # bf16 activations: native bf16 MXU path, bf16 weights, f32 accumulation.
    # (tile_rows must be a multiple of pack*16 for 2-byte dtypes.)
    x_bf16 = {nt: x.astype(jnp.bfloat16) for nt, x in x_dict.items()}
    out_bf16 = hetero_mlp_forward(params, x_bf16, tile_rows=64)
    out_bf16 = jax.tree_util.tree_map(jax.block_until_ready, out_bf16)
    ref_bf16 = _reference_forward(
        params, {nt: x.astype(jnp.float32) for nt, x in x_bf16.items()})
    for nt in x_dict:
        assert out_bf16[nt].dtype == jnp.bfloat16
        assert jnp.allclose(out_bf16[nt].astype(jnp.float32), ref_bf16[nt],
                            atol=5e-2, rtol=5e-2), nt

    # f32 inputs with bf16 outputs: cuts writeback bytes on this mem-bound op.
    out_mixed = hetero_mlp_forward(params, x_dict, tile_rows=32,
                                   out_dtype=jnp.bfloat16)
    out_mixed = jax.tree_util.tree_map(jax.block_until_ready, out_mixed)
    for nt in x_dict:
        assert out_mixed[nt].dtype == jnp.bfloat16
        assert jnp.allclose(out_mixed[nt].astype(jnp.float32), ref[nt],
                            atol=2e-2, rtol=2e-2), nt

    # TODO(synk): BatchNorm1d / Dropout branches are disabled by this config
    # (batch_norm=False, dropout=0.0) and therefore not emitted in the kernel.
    print("KERNEL_OK")
</pallas_src>

<mosaic_0001>
module attributes {stable_mosaic.version = 11 : i64} {
  func.func @_mlp2_kernel(%arg0: i32, %arg1: memref<8x64xf32, #tpu.memory_space<vmem>>, %arg2: memref<64x128xf32, #tpu.memory_space<vmem>>, %arg3: memref<1x128xf32, #tpu.memory_space<vmem>>, %arg4: memref<128x128xf32, #tpu.memory_space<vmem>>, %arg5: memref<1x128xf32, #tpu.memory_space<vmem>>, %arg6: memref<8x128xf32, #tpu.memory_space<vmem>>) attributes {dimension_semantics = [#tpu.dimension_semantics<parallel>], iteration_bounds = array<i64: 2>, scalar_prefetch = 0 : i64, scratch_operands = 0 : i64, tpu.core_type = #tpu.core_type<tc>, window_params = [{transform_indices = @transform_0, window_bounds = array<i64: 8, 64>}, {pipeline_mode = #tpu.pipeline_mode<synchronous>, transform_indices = @transform_1, window_bounds = array<i64: 64, 128>}, {pipeline_mode = #tpu.pipeline_mode<synchronous>, transform_indices = @transform_2, window_bounds = array<i64: 1, 128>}, {pipeline_mode = #tpu.pipeline_mode<synchronous>, transform_indices = @transform_3, window_bounds = array<i64: 128, 128>}, {pipeline_mode = #tpu.pipeline_mode<synchronous>, transform_indices = @transform_4, window_bounds = array<i64: 1, 128>}, {transform_indices = @transform_5, window_bounds = array<i64: 8, 128>}]} {
    %c0 = arith.constant 0 : index
    %c0_0 = arith.constant 0 : index
    %0 = vector.load %arg1[%c0, %c0_0] : memref<8x64xf32, #tpu.memory_space<vmem>>, vector<8x64xf32>
    %c0_1 = arith.constant 0 : index
    %c0_2 = arith.constant 0 : index
    %1 = vector.load %arg2[%c0_1, %c0_2] : memref<64x128xf32, #tpu.memory_space<vmem>>, vector<64x128xf32>
    %cst = arith.constant dense<0.000000e+00> : vector<8x128xf32>
    %2 = tpu.matmul %0, %1, %cst {dimension_numbers = #tpu.dot_dimension_numbers<[1], [0], [0], [1], [0, 0, 1, 1], [], []>} : vector<8x64xf32>, vector<64x128xf32>, vector<8x128xf32> -> vector<8x128xf32>
    %c0_3 = arith.constant 0 : index
    %c0_4 = arith.constant 0 : index
    %3 = vector.load %arg3[%c0_3, %c0_4] : memref<1x128xf32, #tpu.memory_space<vmem>>, vector<1x128xf32>
    %4 = vector.broadcast %3 : vector<1x128xf32> to vector<8x128xf32>
    %5 = arith.addf %2, %4 : vector<8x128xf32>
    %cst_5 = arith.constant 0.00999999977 : f32
    %6 = vector.broadcast %cst_5 : f32 to vector<8x128xf32>
    %7 = arith.mulf %6, %5 : vector<8x128xf32>
    %8 = arith.maximumf %5, %7 : vector<8x128xf32>
    %c0_6 = arith.constant 0 : index
    %c0_7 = arith.constant 0 : index
    %9 = vector.load %arg4[%c0_6, %c0_7] : memref<128x128xf32, #tpu.memory_space<vmem>>, vector<128x128xf32>
    %cst_8 = arith.constant dense<0.000000e+00> : vector<8x128xf32>
    %10 = tpu.matmul %8, %9, %cst_8 {dimension_numbers = #tpu.dot_dimension_numbers<[1], [0], [0], [1], [0, 0, 1, 1], [], []>} : vector<8x128xf32>, vector<128x128xf32>, vector<8x128xf32> -> vector<8x128xf32>
    %c0_9 = arith.constant 0 : index
    %c0_10 = arith.constant 0 : index
    %11 = vector.load %arg5[%c0_9, %c0_10] : memref<1x128xf32, #tpu.memory_space<vmem>>, vector<1x128xf32>
    %12 = vector.broadcast %11 : vector<1x128xf32> to vector<8x128xf32>
    %13 = arith.addf %10, %12 : vector<8x128xf32>
    %cst_11 = arith.constant 0.00999999977 : f32
    %14 = vector.broadcast %cst_11 : f32 to vector<8x128xf32>
    %15 = arith.mulf %14, %13 : vector<8x128xf32>
    %16 = arith.maximumf %13, %15 : vector<8x128xf32>
    %c0_12 = arith.constant 0 : index
    %c0_13 = arith.constant 0 : index
    %17 = vector.load %arg6[%c0_12, %c0_13] : memref<8x128xf32, #tpu.memory_space<vmem>>, vector<8x128xf32>
    tpu.vector_store %arg6[%c0_12, %c0_13], %16 {strides = array<i32>} : memref<8x128xf32, #tpu.memory_space<vmem>>, vector<8x128xf32>,
    return
  }
  func.func @transform_0(%arg0: i32) -> (i32, i32) {
    %c0_i32 = arith.constant 0 : i32
    %c0_i32_0 = arith.constant 0 : i32
    return %arg0, %c0_i32 : i32, i32
  }
  func.func @transform_1(%arg0: i32) -> (i32, i32) {
    %c0_i32 = arith.constant 0 : i32
    %c0_i32_0 = arith.constant 0 : i32
    %c0_i32_1 = arith.constant 0 : i32
    return %c0_i32, %c0_i32_0 : i32, i32
  }
  func.func @transform_2(%arg0: i32) -> (i32, i32) {
    %c0_i32 = arith.constant 0 : i32
    %c0_i32_0 = arith.constant 0 : i32
    %c0_i32_1 = arith.constant 0 : i32
    return %c0_i32, %c0_i32_0 : i32, i32
  }
  func.func @transform_3(%arg0: i32) -> (i32, i32) {
    %c0_i32 = arith.constant 0 : i32
    %c0_i32_0 = arith.constant 0 : i32
    %c0_i32_1 = arith.constant 0 : i32
    return %c0_i32, %c0_i32_0 : i32, i32
  }
  func.func @transform_4(%arg0: i32) -> (i32, i32) {
    %c0_i32 = arith.constant 0 : i32
    %c0_i32_0 = arith.constant 0 : i32
    %c0_i32_1 = arith.constant 0 : i32
    return %c0_i32, %c0_i32_0 : i32, i32
  }
  func.func @transform_5(%arg0: i32) -> (i32, i32) {
    %c0_i32 = arith.constant 0 : i32
    %c0_i32_0 = arith.constant 0 : i32
    return %arg0, %c0_i32 : i32, i32
  }
}

</mosaic_0001>

<bundles_post_ra>
// kernel: tpu_custom_call.1
= control target key start
LH: loop header
LB: loop body
LE: loop exit
PB: predicated region body
PF: predicated region fallthrough
CT: control target
= control target key end

     0   :  { %10 = vsyncpa [#allocation3], 0  ;;  %s1206_s0 = inlined_call_operand.hbm [shape: f32[12,64], index: 0, kind: input, shape index: {}]   ;;  %s1207_s1 = inlined_call_operand.hbm [shape: f32[64,128], index: 1, kind: input, shape index: {}]   ;;  %s1208_s2 = inlined_call_operand.vmem [shape: f32[1,128], index: 2, kind: input, shape index: {}]   ;;  %s1209_s3 = inlined_call_operand.hbm [shape: f32[128,128], index: 3, kind: input, shape index: {}]   ;;  %s1210_s4 = inlined_call_operand.vmem [shape: f32[1,128], index: 4, kind: input, shape index: {}]   ;;  %s1211_s5 = inlined_call_operand.hbm [shape: f32[12,128], index: 5, kind: output, shape index: {}]  }
   0x1   :  { %12 = vsyncpa [#allocation3 + $0x1], 0 }
   0x2   :  { %13 = vsyncpa [#allocation6], 0 }
   0x3   :  { %14 = vsyncpa [#allocation4], 0 }
   0x4   :  { %16 = vsyncpa [#allocation4 + $0x1], 0  ;;  %s964_s18 = smov 0   ;;  %s966_s19 = smov 0  }
   0x5   :  { %s968_s20 = smov 0   ;;  %s970_s21 = smov 0  }
   0x6 LB: > { %s985_s22 = sadd.s32 4294967295, %s923_s21   ;;  %s560_s23 = sadd.s32 4294967294, %s923_s21   ;;  %s923_s21 = sphi %s970_s21, %s1231_s21   ;;  %s919_s20 = sphi %s968_s20, %s1230_s20   ;;  %s915_s19 = sphi %s966_s19, %s1229_s19   ;;  %s911_s18 = sphi %s964_s18, %s1228_s18  }
   0x7   : > { %p42_p0 = scmp.ne.s32.totalorder %s915_s19, %s911_s18  ;;  %p1212_p1 = scmp.eq.s32.totalorder %s985_s22, 0 }
   0x8   : > { %p156_p3 = scmp.eq.s32.totalorder %s560_s23, 1  ;;  %p561_p5 = scmp.ge.s32.totalorder %s923_s21, 1 }
   0x9   : > { %p994_p4 = por %p1212_p1, %p42_p0  ;;  %p163_p7 = scmp.lt.s32.totalorder %s923_s21, 3 }
   0xa   : > { %p999_p6 = por %p156_p3, %p42_p0  ;;  %s925_s27 = smov [#allocation5]  }
   0xb   : > { %s1215_s24 = scalar_select %p994_p4, 1, 0 }
   0xc   : > { %s1216_s25 = scalar_select %p999_p6, 1, 0 }
   0xd   : > { %p1004_p8 = pnand %p561_p5, %p163_p7  ;;  %s175_s28 = sshll.u32 %s925_s27, 4  ;;  %s1008_s28 = int_to_ptr.vmem [resolvable:$true] %s175_s28 }
   0xe   : > { %s926_s30 = smov [#allocation7]   ;;  %s767_s9 = scalar_lea.hbm %s1207_s1, 1024 }
   0xf   : > { %p707_p9 = pneg %p1004_p8  ;;  %s191_s6 = sshll.u32 %s926_s30, 4  ;;  %s1019_s6 = int_to_ptr.vmem [resolvable:$true] %s191_s6 }
  0x10   : > { %p768_p12 = scmp.ne.s32.totalorder %s1207_s1, %s767_s9  ;;  %p774_p5 = scmp.lt.u32.totalorder %s767_s9, %s1207_s1 }
  0x11   : > { %p1015_p11 = pnand %p707_p9, %p1212_p1 }
  0x13   : > { %p769_p13 = pneg %p1015_p11 }
  0x15   : > { %p770_p0 = pnand %p769_p13, %p768_p12 }
  0x17   : > { %p771_p3 = pneg %p770_p0 }
  0x19   : > { %p776_p7 = pnand %p774_p5, %p771_p3 }
  0x1b   : > { %779 = shalt.err (!%p776_p7)
}
  0x1c   : > { %s780_s14 = scalar_lea.vmem %s1008_s28, 1024  ;;  %p788_p2 = scmp.lt.s32.totalorder %s1008_s28, %s1008_s28 }
  0x1d   : > { %p781_p9 = scmp.ne.s32.totalorder %s1008_s28, %s780_s14  ;;  %p789_p12 = scmp.lt.s32.totalorder %s780_s14, %s780_s14 }
  0x1f   : > { %p783_p10 = pnand %p781_p9, %p769_p13  ;;  %p790_p0 = por %p789_p12, %p788_p2 }
  0x21   : > { %p784_p1 = pneg %p783_p10 }
  0x23   : > { %p791_p6 = pnand %p790_p0, %p784_p1 }
  0x25   : > { %794 = shalt.err (!%p791_p6)
}
  0x26   : > { %s927_s15 = smov 128   ;;  %s928_s16 = smov 8  }
  0x27   : > { %710 = dma.hbm_to_vmem [thread:$0]  (!%p1015_p11), %s1207_s1, 1024, %s1008_s28, [#allocation6], %s927_s15, %s927_s15, %s928_s16  }
  0x28   : > { %s795_s7 = scalar_lea.hbm %s1209_s3, 2048 }
  0x29   : > { %p796_p2 = scmp.ne.s32.totalorder %s1209_s3, %s795_s7  ;;  %p802_p10 = scmp.lt.u32.totalorder %s795_s7, %s1209_s3 }
  0x2b   : > { %p798_p1 = pnand %p796_p2, %p769_p13 }
  0x2d   : > { %p799_p6 = pneg %p798_p1 }
  0x2f   : > { %p804_p3 = pnand %p802_p10, %p799_p6 }
  0x31   : > { %807 = shalt.err (!%p804_p3)
}
  0x32   : > { %s808_s28 = scalar_lea.vmem %s1019_s6, 2048  ;;  %p816_p12 = scmp.lt.s32.totalorder %s1019_s6, %s1019_s6 }
  0x33   : > { %p809_p5 = scmp.ne.s32.totalorder %s1019_s6, %s808_s28  ;;  %p817_p0 = scmp.lt.s32.totalorder %s808_s28, %s808_s28 }
  0x35   : > { %p811_p7 = pnand %p809_p5, %p769_p13  ;;  %p818_p2 = por %p817_p0, %p816_p12 }
  0x37   : > { %p812_p9 = pneg %p811_p7 }
  0x39   : > { %p819_p1 = pnand %p818_p2, %p812_p9 }
  0x3b   : > { %822 = shalt.err (!%p819_p1)
}
  0x3c   : > { %713 = dma.hbm_to_vmem [thread:$0]  (!%p1015_p11), %s1209_s3, 2048, %s1019_s6, [#allocation6], %s927_s15, %s927_s15, %s928_s16  }
  0x3d   : > { %s1074_s14 = sadd.s32 1, %s923_s21   ;;  %s29_s29 = sadd.s32 1, %s919_s20 }
  0x3e   : > { %s26_s17 = ssub.s32 %s923_s21, %s1074_s14  ;;  %p36_p13 = scmp.ne.s32.totalorder %s919_s20, %s915_s19 }
  0x3f   : > { %p27_p6 = scmp.eq.s32.totalorder %s26_s17, 0  ;;  %p37_p10 = scmp.eq.s32.totalorder %s923_s21, 0 }
  0x40   : > { %p1219_p3 = scmp.eq.s32.totalorder %s985_s22, 1  ;;  %p724_p7 = scmp.lt.s32.totalorder %s923_s21, 2 }
  0x41   : > { %s1090_s27 = scalar_select %p27_p6, %s919_s20, %s29_s29  }
  0x42   : > { %p1084_p5 = por %p1219_p3, %p36_p13  ;;  %p38_p9 = por %p37_p10, %p36_p13 }
  0x43   : > { %s208_s30 = sand.u32 1, %s919_s20   ;;  %s566_s6 = sshll.u32 %s923_s21, 7 }
  0x44   : > { %s1220_s23 = scalar_select %p1084_p5, 1, 0 }
  0x45   : > { %s565_s7 = sshll.u32 %s208_s30, 3  ;;  %s1097_s8 = scalar_lea.hbm %s1206_s0, %s566_s6 }
  0x46   : > { %s212_s9 = scalar_lea.vmem [#allocation2], %s565_s7  ;;  %p1101_p11 = pnand %p724_p7, %p38_p9 }
  0x47   : > { %s219_s10 = sshll.u32 %s212_s9, 4  ;;  %s209_s28 = scalar_lea.sflag [#allocation3], %s208_s30  ;;  %s1099_s10 = int_to_ptr.vmem [resolvable:$true] %s219_s10 }
  0x48   : > { %s823_s12 = scalar_lea.hbm %s1097_s8, 128  ;;  %p825_p0 = pneg %p1101_p11 }
  0x49   : > { %p824_p12 = scmp.ne.s32.totalorder %s1097_s8, %s823_s12  ;;  %s828_s17 = scalar_lea.hbm %s1206_s0, 256 }
  0x4a   : > { %p829_p13 = scmp.lt.u32.totalorder %s1097_s8, %s1206_s0  ;;  %p830_p6 = scmp.lt.u32.totalorder %s828_s17, %s823_s12 }
  0x4b   : > { %p826_p2 = pnand %p825_p0, %p824_p12  ;;  %p832_p3 = scmp.lt.u32.totalorder %s823_s12, %s1097_s8 }
  0x4c   : > { %p831_p10 = por %p830_p6, %p829_p13 }
  0x4d   : > { %p827_p1 = pneg %p826_p2 }
  0x4e   : > { %p833_p7 = por %p832_p3, %p831_p10 }
  0x50   : > { %p834_p9 = pnand %p833_p7, %p827_p1 }
  0x52   : > { %837 = shalt.err (!%p834_p9)
}
  0x53   : > { %s838_s30 = scalar_lea.vmem %s1099_s10, 128  ;;  %s929_s15 = smov [#allocation2]  }
  0x54   : > { %p839_p12 = scmp.ne.s32.totalorder %s1099_s10, %s838_s30  ;;  %s843_s16 = sshll.u32 %s929_s15, 4  ;;  %s844_s16 = int_to_ptr.vmem [resolvable:$false] %s843_s16 }
  0x55   : > { %s845_s9 = scalar_lea.vmem %s844_s16, 256  ;;  %p846_p4 = scmp.lt.s32.totalorder %s1099_s10, %s844_s16 }
  0x56   : > { %p841_p2 = pnand %p839_p12, %p825_p0  ;;  %p847_p13 = scmp.lt.s32.totalorder %s845_s9, %s838_s30 }
  0x58   : > { %p842_p5 = pneg %p841_p2  ;;  %p848_p6 = por %p847_p13, %p846_p4 }
  0x5a   : > { %p849_p10 = pnand %p848_p6, %p842_p5 }
  0x5c   : > { %852 = shalt.err (!%p849_p10)
}
  0x5d   : > { %717 = dma.hbm_to_vmem [thread:$0]  (!%p1101_p11), %s1097_s8, 128, %s1099_s10, %s209_s28  }
  0x5e   : > { %228 = sbr.rel (%p1004_p8) target bundleno = 573 (0x23d), region = 40  ;;  %s1133_s12 = sand.u32 (!%p1004_p8), 1, %s915_s19  }
  0x5f   : > { %s568_s13 = sshll.u32 (!%p1004_p8), %s1133_s12, 3  ;;  %s231_s29 = scalar_lea.sflag (!%p1004_p8), [#allocation3], %s1133_s12 }
  0x60   : > { %s1139_s17 = scalar_lea.vmem (!%p1004_p8), [#allocation2], %s568_s13  ;;  %p1222_p4 = scmp.ne.s32.totalorder (!%p1004_p8), %s1215_s24, 0 }
  0x65   : > { %898 = dma.done.wait (%p1222_p4), %s231_s29, 128  }
  0x66   : > { %900 = vsyncadd (%p1222_p4), %s231_s29, 4294967168  ;;  %p1223_p5 = scmp.eq.s32.totalorder %s985_s22, 0 }
  0x68   : > { %902 = dma.done.wait (%p1223_p5), [#allocation6], 3072   ;;  %p1224_p8 = pmov %p1223_p5 }
  0x69   : > { %v930_v0 = vmov 0.0|0.0   ;;  %vm931_vm0 = vmmov 0   ;;  %v932_v1 = vmov 0.0   ;;  %v270_v2 = vld [vmem:[#allocation5] sm:$0xff]  ;;  %v271_v3 = vld [vmem:[#allocation5 + $0x8] sm:$0xff]  ;;  %v272_v4 = vld [vmem:[#allocation5 + $0x10] sm:$0xff] }
  0x6a   : > { %904 = vsyncadd (%p1224_p8), [#allocation6], 4294964224  ;;  %659 = vmatprep.subr.bf16.mxu0 %v930_v0  ;;  %621 = vmatprep.mubr.msk.f32.mxu0 %vm931_vm0, %v932_v1  ;;  %v660_v5 = vpack.c.bf16 %v271_v3, %v270_v2  ;;  %v273_v6 = vld [vmem:[#allocation5 + $0x18] sm:$0xff]  ;;  %v361_v8 = vld [vmem:[#allocation7] sm:$0xff]  ;;  %vm285_vm1 = vcmask 523264   ;;  %s576_s11 = sshll.u32 %s985_s22, 7 }
  0x6b   : > { %671 = vmatprep.subr.bf16.mxu1 %v930_v0  ;;  %656 = vmatprep.mubr.msk.f32.mxu1 %vm931_vm0, %v932_v1  ;;  %v663_v7 = vpack.c.bf16 %v273_v6, %v272_v4  ;;  %v362_v9 = vld [vmem:[#allocation7 + $0x8] sm:$0xff]  ;;  %v363_v10 = vld [vmem:[#allocation7 + $0x10] sm:$0xff]  ;;  %v274_v11 = vld [vmem:[#allocation5 + $0x20] sm:$0xff]  ;;  %s268_s28 = scalar_lea.vmem [#allocation8], %s568_s13  ;;  %s1162_s15 = scalar_lea.hbm %s1211_s5, %s576_s11 }
  0x6c   : > { %661 = vmatpush3.bf16.msra.mxu0 %v660_v5  ;;  %v275_v12 = vld [vmem:[#allocation5 + $0x28] sm:$0xff]  ;;  %v672_v13 = vpack.c.bf16 %v362_v9, %v361_v8  ;;  %v364_v14 = vld [vmem:[#allocation7 + $0x18] sm:$0xff]  ;;  %v365_v17 = vld [vmem:[#allocation7 + $0x20] sm:$0xff]  ;;  %s471_s7 = sshll.u32 %s268_s28, 4  ;;  %s458_s16 = scalar_lea.sflag [#allocation4], %s1133_s12  ;;  %s1164_s7 = int_to_ptr.vmem [resolvable:$true] %s471_s7 }
  0x6d   : > { %662 = vmatprep.subr.bf16.mxu0 %v930_v0  ;;  %v675_v15 = vpack.c.bf16 %v364_v14, %v363_v10  ;;  %v666_v16 = vpack.c.bf16 %v275_v12, %v274_v11  ;;  %v366_v18 = vld [vmem:[#allocation7 + $0x28] sm:$0xff]  ;;  %v276_v19 = vld [vmem:[#allocation5 + $0x30] sm:$0xff]  ;;  %v277_v20 = vld [vmem:[#allocation5 + $0x38] sm:$0xff]  ;;  %s853_s9 = scalar_lea.vmem %s1164_s7, 128  ;;  %p1225_p0 = scmp.ne.s32.totalorder %s1220_s23, 0 }
  0x6e   : > { %673 = vmatpush3.bf16.msra.mxu1 %v672_v13  ;;  %v678_v21 = vpack.c.bf16 %v366_v18, %v365_v17  ;;  %v669_v22 = vpack.c.bf16 %v277_v20, %v276_v19  ;;  %v367_v23 = vld [vmem:[#allocation7 + $0x30] sm:$0xff]  ;;  %v368_v24 = vld [vmem:[#allocation7 + $0x38] sm:$0xff]  ;;  %v369_v27 = vld [vmem:[#allocation7 + $0x40] sm:$0xff]  ;;  %p854_p11 = scmp.ne.s32.totalorder %s1164_s7, %s853_s9  ;;  %s933_s22 = smov [#allocation8]  }
  0x6f   : > { %674 = vmatprep.subr.bf16.mxu1 %v930_v0  ;;  %v681_v25 = vpack.c.bf16 %v368_v24, %v367_v23  ;;  %v269_v26 = vld [vmem:[%s1139_s17] sm:$0xff]  ;;  %v370_v28 = vld [vmem:[#allocation7 + $0x48] sm:$0xff]  ;;  %v373_v33 = vld [vmem:[#allocation7 + $0x60] sm:$0xff]  ;;  %s857_s13 = sshll.u32 %s933_s22, 4  ;;  %s858_s13 = int_to_ptr.vmem [resolvable:$false] %s857_s13 }
  0x70   : > { %664 = vmatpush3.bf16.msra.mxu0 %v663_v7  ;;  %v684_v29 = vpack.c.bf16 %v370_v28, %v369_v27  ;;  %v371_v30 = vld [vmem:[#allocation7 + $0x50] sm:$0xff]  ;;  %v372_v31 = vld [vmem:[#allocation7 + $0x58] sm:$0xff]  ;;  %v374_v34 = vld [vmem:[#allocation7 + $0x68] sm:$0xff]  ;;  %p855_p1 = pnand %p854_p11, %p1225_p0  ;;  %s859_s29 = scalar_lea.vmem %s858_s13, 256 }
  0x71   : > { %665 = vmatprep.subr.bf16.mxu0 %v930_v0  ;;  %v687_v32 = vpack.c.bf16 %v372_v31, %v371_v30  ;;  %v690_v35 = vpack.c.bf16 %v374_v34, %v373_v33  ;;  %v375_v36 = vld [vmem:[#allocation7 + $0x70] sm:$0xff]  ;;  %v376_v37 = vld [vmem:[#allocation7 + $0x78] sm:$0xff]  ;;  %p860_p7 = scmp.lt.s32.totalorder %s1164_s7, %s858_s13  ;;  %p861_p9 = scmp.lt.s32.totalorder %s859_s29, %s853_s9 }
  0x72   : > { %676 = vmatpush3.bf16.msra.mxu1 %v675_v15  ;;  %v693_v38 = vpack.c.bf16 %v376_v37, %v375_v36  ;;  %v572_v39 = vld [vmem:[%s1208_s2] ss:$0 sm:$0xff]  ;;  %p856_p3 = pneg %p855_p1 }
  0x73   : > { %677 = vmatprep.subr.bf16.mxu1 %v930_v0  ;;  %v574_v45 = vld [vmem:[%s1210_s4] ss:$0 sm:$0xff]  ;;  %p862_p12 = por %p861_p9, %p860_p7 }
  0x74   : > { %667 = vmatpush3.bf16.msra.mxu0 %v666_v16 }
  0x75   : > { %668 = vmatprep.subr.bf16.mxu0 %v930_v0  ;;  %p863_p2 = pnand %p862_p12, %p856_p3 }
  0x76   : > { %679 = vmatpush3.bf16.msra.mxu1 %v678_v21 }
  0x77   : > { %680 = vmatprep.subr.bf16.mxu1 %v930_v0 }
  0x78   : > { %670 = vmatpush3.bf16.msra.mxu0 %v669_v22 }
  0x7a   : > { %682 = vmatpush3.bf16.msra.mxu1 %v681_v25 }
  0x7b   : > { %622 = vmatmul.mubr.msk.f32.vlgmr.msra.gmra.mrb[0].mxu0 %vm285_vm1, %v269_v26  ;;  %683 = vmatprep.subr.bf16.mxu1 %v930_v0 }
  0x7e   : > { %685 = vmatpush3.bf16.msra.mxu1 %v684_v29 }
  0x7f   : > { %686 = vmatprep.subr.bf16.mxu1 %v930_v0 }
  0x82   : > { %688 = vmatpush3.bf16.msra.mxu1 %v687_v32 }
  0x83   : > { %689 = vmatprep.subr.bf16.mxu1 %v930_v0 }
  0x86   : > { %691 = vmatpush3.bf16.msra.mxu1 %v690_v35 }
  0x87   : > { %692 = vmatprep.subr.bf16.mxu1 %v930_v0 }
  0x8a   : > { %694 = vmatpush3.bf16.msra.mxu1 %v693_v38 }
 0x14e   : > { %v355_v40 = vpop.f32.mrb[0].mxu0 }
 0x14f   : > { %v356_v41 = vadd.f32 %v572_v39, %v355_v40  ;;  %v623_v42 = vpop.f32.mrb[1].mxu0 }
 0x151   : > { %v359_v43 = vmul.f32 0.01, %v356_v41 }
 0x153   : > { %v360_v44 = vmax.f32 %v356_v41, %v359_v43 }
 0x155   : > { %657 = vmatmul.mubr.f32.vlgmr.msra.gmra.mrb[0].mxu1 %v360_v44 }
 0x228   : > { %v450_v46 = vpop.f32.mrb[0].mxu1 }
 0x229   : > { %v451_v47 = vadd.f32 %v574_v45, %v450_v46  ;;  %v658_v48 = vpop.f32.mrb[1].mxu1 }
 0x22b   : > { %v454_v49 = vmul.f32 0.01, %v451_v47 }
 0x22d   : > { %v455_v50 = vmax.f32 %v451_v47, %v454_v49 }
 0x22f   : > { %456 = vst [vmem:[%s268_s28] sm:$0xff] %v455_v50 }
 0x230   : > { %866 = shalt.err (!%p863_p2)
}
 0x231   : > { %s867_s12 = scalar_lea.hbm %s1162_s15, 128  ;;  %s871_s26 = scalar_lea.hbm %s1211_s5, 256 }
 0x232   : > { %p868_p13 = scmp.ne.s32.totalorder %s1162_s15, %s867_s12  ;;  %p872_p4 = scmp.lt.u32.totalorder %s1162_s15, %s1211_s5 }
 0x233   : > { %p873_p5 = scmp.lt.u32.totalorder %s871_s26, %s867_s12  ;;  %p875_p11 = scmp.lt.u32.totalorder %s867_s12, %s1162_s15 }
 0x234   : > { %p869_p6 = pnand %p868_p13, %p1225_p0 }
 0x235   : > { %p874_p8 = por %p873_p5, %p872_p4 }
 0x236   : > { %p870_p10 = pneg %p869_p6 }
 0x237   : > { %p876_p1 = por %p875_p11, %p874_p8 }
 0x239   : > { %p877_p3 = pnand %p876_p1, %p870_p10 }
 0x23b   : > { %880 = shalt.err (!%p877_p3)
}
 0x23c   : > { %705 = dma.vmem_to_hbm [thread:$0]  (%p1225_p0), %s1164_s7, 128, %s1162_s15, %s458_s16  }
 0x23d PF: > { %s483_s11 = sand.u32 1, %s911_s18   ;;  %p1226_p7 = scmp.ne.s32.totalorder %s1216_s25, 0 }
 0x23e   : > { %p1227_p9 = scmp.ge.s32.totalorder %s923_s21, 2  ;;  %s484_s28 = scalar_lea.sflag [#allocation4], %s483_s11 }
 0x240   : > { %p719_p12 = pnand %p1227_p9, %p1226_p7 }
 0x242   : > { %906 = dma.done.wait (!%p719_p12), %s484_s28, 128  }
 0x243   : > { %908 = vsyncadd (!%p719_p12), %s484_s28, 4294967168  ;;  %p19_p2 = scmp.ge.s32.totalorder %s1074_s14, 4   ;;  %s1228_s18 = smov %s915_s19 }
 0x244   : > { %s1229_s19 = smov %s919_s20  ;;  %s1230_s20 = smov %s1090_s27 }
 0x245   : > { %s1231_s21 = smov %s1074_s14  ;;  %21 = sbr.rel (!%p19_p2) target bundleno = 6 (0x6), region = 93 }
 0x24c   :  { %489 = vsyncpa [#allocation3], 1 }
 0x24d   :  { %491 = vsyncpa [#allocation3 + $0x1], 1 }
 0x24e   :  { %492 = vsyncpa [#allocation6], 1 }
 0x24f   :  { %493 = vsyncpa [#allocation4], 1 }
 0x250   :  { %495 = vsyncpa [#allocation4 + $0x1], 1 }

</bundles_post_ra>
